<compile_context>
chip_gen: v7x
topology: tpu7x:2x2x1
jax: 0.10.0
libtpu: 0.0.40
codegen_flags: <defaults>
</compile_context>

<pallas_src>
import functools

import jax
import jax.numpy as jnp
from jax.experimental import pallas as pl
from jax.experimental.pallas import tpu as pltpu

IN_FEATURES = 768
HIDDEN = 100
N_FOODS = 64          # stand-in for len(all_foods)
HIDDEN_PAD = 128      # lane-aligned hidden dim


def _round_up(x, m):
    return ((x + m - 1) // m) * m


def mlp_kernel(x_ref, w1_ref, b1_ref, w2_ref, b2_ref, o_ref):
    # x arrives in its native dtype (f32) straight from HBM; the bf16 cast for
    # the MXU happens here on the VPU instead of as a wrapper-side XLA copy.
    x = x_ref[...].astype(jnp.bfloat16)
    # fc1 (bf16 x bf16 -> f32 acc) + bias + ReLU
    h = jnp.dot(x, w1_ref[...], preferred_element_type=jnp.float32)
    h = jnp.maximum(h + b1_ref[...], 0.0)
    # fc3 + bias + ReLU
    z = jnp.dot(h.astype(jnp.bfloat16), w2_ref[...],
                preferred_element_type=jnp.float32)
    z = jnp.maximum(z + b2_ref[...], 0.0)
    # Sigmoid: exp and the approx reciprocal both run on the EUP slot
    # (~1e-3 accurate; fine for this head, not bit-parity with torch.sigmoid).
    o_ref[...] = pl.reciprocal(1.0 + jnp.exp(-z), approx=True)


def prepack_params(w1, b1, w2, b2):
    """One-time prepack (do this outside the hot path): pad the hidden dim to
    128 lanes and cast weights to bf16. Padded W1 columns / W2 rows are zero,
    so they contribute nothing to the result."""
    w1p = jnp.zeros((IN_FEATURES, HIDDEN_PAD), jnp.bfloat16)
    w1p = w1p.at[:, :HIDDEN].set(w1.astype(jnp.bfloat16))
    b1p = jnp.zeros((1, HIDDEN_PAD), jnp.float32)
    b1p = b1p.at[:, :HIDDEN].set(b1.reshape(1, HIDDEN).astype(jnp.float32))
    w2p = jnp.zeros((HIDDEN_PAD, N_FOODS), jnp.bfloat16)      # pad rows zero
    w2p = w2p.at[:HIDDEN, :].set(w2.astype(jnp.bfloat16))
    b2p = b2.reshape(1, N_FOODS).astype(jnp.float32)
    return w1p, b1p, w2p, b2p


@functools.partial(jax.jit, static_argnames=("tb",))
def net_forward(x, w1p, b1p, w2p, b2p, *, tb=512):
    """x: [B, 768] f32 (or bf16). Prepacked params from prepack_params."""
    B = x.shape[0]
    # Sublane-aligned batch tile, capped at `tb`, and small enough that the
    # grid has >= 2 steps whenever B allows (keeps both v7x TCs busy; harmless
    # on v5e/v6e). TB=512 f32 double-buffered is ~3 MiB of VMEM.
    TB = max(8, min(tb, _round_up(pl.cdiv(B, 2), 8)))
    grid = (pl.cdiv(B, TB),)   # ragged last block: padded reads, masked stores

    return pl.pallas_call(
        mlp_kernel,
        out_shape=jax.ShapeDtypeStruct((B, N_FOODS), jnp.float32),
        grid=grid,
        in_specs=[
            pl.BlockSpec((TB, IN_FEATURES), lambda i: (i, 0)),          # x tile
            pl.BlockSpec((IN_FEATURES, HIDDEN_PAD), lambda i: (0, 0)),  # W1 (resident)
            pl.BlockSpec((1, HIDDEN_PAD), lambda i: (0, 0)),            # b1
            pl.BlockSpec((HIDDEN_PAD, N_FOODS), lambda i: (0, 0)),      # W2 (resident)
            pl.BlockSpec((1, N_FOODS), lambda i: (0, 0)),               # b2
        ],
        out_specs=pl.BlockSpec((TB, N_FOODS), lambda i: (i, 0)),
        compiler_params=pltpu.CompilerParams(
            dimension_semantics=("parallel",)),
    )(x, w1p, b1p, w2p, b2p)


def init_params(key):
    # Deterministic init mimicking PyTorch Linear default: U(-1/sqrt(in), 1/sqrt(in))
    k1, k2, k3, k4 = jax.random.split(key, 4)
    bound1 = 1.0 / jnp.sqrt(IN_FEATURES)
    bound2 = 1.0 / jnp.sqrt(HIDDEN)
    w1 = jax.random.uniform(k1, (IN_FEATURES, HIDDEN), jnp.float32, -bound1, bound1)
    b1 = jax.random.uniform(k2, (HIDDEN,), jnp.float32, -bound1, bound1)
    w2 = jax.random.uniform(k3, (HIDDEN, N_FOODS), jnp.float32, -bound2, bound2)
    b2 = jax.random.uniform(k4, (N_FOODS,), jnp.float32, -bound2, bound2)
    return w1, b1, w2, b2


def _reference(x, w1, b1, w2, b2):
    # Reference matching the kernel's numerics: bf16 inputs/weights, f32 accumulation.
    xf = x.astype(jnp.bfloat16).astype(jnp.float32)
    w1f = w1.astype(jnp.bfloat16).astype(jnp.float32)
    w2f = w2.astype(jnp.bfloat16).astype(jnp.float32)
    h = jnp.maximum(xf @ w1f + b1.reshape(1, -1), 0.0)
    z = jnp.maximum(h.astype(jnp.bfloat16).astype(jnp.float32) @ w2f
                    + b2.reshape(1, -1), 0.0)
    return jax.nn.sigmoid(z)


if __name__ == "__main__":
    key = jax.random.PRNGKey(0)
    kx, kp = jax.random.split(key)
    w1, b1, w2, b2 = init_params(kp)
    packed = prepack_params(w1, b1, w2, b2)

    # Small aligned batch (single tile) + a small ragged batch (exercises the
    # pl.cdiv multi-step grid with a masked partial last block).
    for batch in (8, 12):
        x = jax.random.normal(jax.random.fold_in(kx, batch),
                              (batch, IN_FEATURES), jnp.float32)
        out = jax.block_until_ready(net_forward(x, *packed))
        assert out.shape == (batch, N_FOODS)

        ref = _reference(x, w1, b1, w2, b2)
        err = float(jnp.max(jnp.abs(out - ref)))
        assert err < 1e-2, f"max abs err {err} too large for batch={batch}"

    print("KERNEL_OK")
</pallas_src>

<mosaic_0001>
module attributes {stable_mosaic.version = 11 : i64} {
  func.func @mlp_kernel(%arg0: i32, %arg1: memref<8x768xf32, #tpu.memory_space<vmem>>, %arg2: memref<768x128xbf16, #tpu.memory_space<vmem>>, %arg3: memref<1x128xf32, #tpu.memory_space<vmem>>, %arg4: memref<128x64xbf16, #tpu.memory_space<vmem>>, %arg5: memref<1x64xf32, #tpu.memory_space<vmem>>, %arg6: memref<8x64xf32, #tpu.memory_space<vmem>>) attributes {dimension_semantics = [#tpu.dimension_semantics<parallel>], iteration_bounds = array<i64: 1>, scalar_prefetch = 0 : i64, scratch_operands = 0 : i64, tpu.core_type = #tpu.core_type<tc>, window_params = [{transform_indices = @transform_0, window_bounds = array<i64: 8, 768>}, {pipeline_mode = #tpu.pipeline_mode<synchronous>, transform_indices = @transform_1, window_bounds = array<i64: 768, 128>}, {pipeline_mode = #tpu.pipeline_mode<synchronous>, transform_indices = @transform_2, window_bounds = array<i64: 1, 128>}, {pipeline_mode = #tpu.pipeline_mode<synchronous>, transform_indices = @transform_3, window_bounds = array<i64: 128, 64>}, {pipeline_mode = #tpu.pipeline_mode<synchronous>, transform_indices = @transform_4, window_bounds = array<i64: 1, 64>}, {transform_indices = @transform_5, window_bounds = array<i64: 8, 64>}]} {
    %c0 = arith.constant 0 : index
    %c0_0 = arith.constant 0 : index
    %0 = vector.load %arg1[%c0, %c0_0] : memref<8x768xf32, #tpu.memory_space<vmem>>, vector<8x768xf32>
    %1 = arith.truncf %0 : vector<8x768xf32> to vector<8x768xbf16>
    %c0_1 = arith.constant 0 : index
    %c0_2 = arith.constant 0 : index
    %2 = vector.load %arg2[%c0_1, %c0_2] : memref<768x128xbf16, #tpu.memory_space<vmem>>, vector<768x128xbf16>
    %cst = arith.constant dense<0.000000e+00> : vector<8x128xf32>
    %3 = tpu.matmul %1, %2, %cst {dimension_numbers = #tpu.dot_dimension_numbers<[1], [0], [0], [1], [0, 0, 1, 1], [], []>} : vector<8x768xbf16>, vector<768x128xbf16>, vector<8x128xf32> -> vector<8x128xf32>
    %c0_3 = arith.constant 0 : index
    %c0_4 = arith.constant 0 : index
    %4 = vector.load %arg3[%c0_3, %c0_4] : memref<1x128xf32, #tpu.memory_space<vmem>>, vector<1x128xf32>
    %5 = vector.broadcast %4 : vector<1x128xf32> to vector<8x128xf32>
    %6 = arith.addf %3, %5 : vector<8x128xf32>
    %cst_5 = arith.constant 0.000000e+00 : f32
    %7 = vector.broadcast %cst_5 : f32 to vector<8x128xf32>
    %8 = arith.maximumf %6, %7 : vector<8x128xf32>
    %9 = arith.truncf %8 : vector<8x128xf32> to vector<8x128xbf16>
    %c0_6 = arith.constant 0 : index
    %c0_7 = arith.constant 0 : index
    %10 = vector.load %arg4[%c0_6, %c0_7] : memref<128x64xbf16, #tpu.memory_space<vmem>>, vector<128x64xbf16>
    %cst_8 = arith.constant dense<0.000000e+00> : vector<8x64xf32>
    %11 = tpu.matmul %9, %10, %cst_8 {dimension_numbers = #tpu.dot_dimension_numbers<[1], [0], [0], [1], [0, 0, 1, 1], [], []>} : vector<8x128xbf16>, vector<128x64xbf16>, vector<8x64xf32> -> vector<8x64xf32>
    %c0_9 = arith.constant 0 : index
    %c0_10 = arith.constant 0 : index
    %12 = vector.load %arg5[%c0_9, %c0_10] : memref<1x64xf32, #tpu.memory_space<vmem>>, vector<1x64xf32>
    %13 = vector.broadcast %12 : vector<1x64xf32> to vector<8x64xf32>
    %14 = arith.addf %11, %13 : vector<8x64xf32>
    %cst_11 = arith.constant 0.000000e+00 : f32
    %15 = vector.broadcast %cst_11 : f32 to vector<8x64xf32>
    %16 = arith.maximumf %14, %15 : vector<8x64xf32>
    %cst_12 = arith.constant 0.000000e+00 : f32
    %17 = vector.broadcast %cst_12 : f32 to vector<8x64xf32>
    %18 = arith.subf %17, %16 : vector<8x64xf32>
    %19 = math.exp %18 : vector<8x64xf32>
    %cst_13 = arith.constant 1.000000e+00 : f32
    %20 = vector.broadcast %cst_13 : f32 to vector<8x64xf32>
    %21 = arith.addf %20, %19 : vector<8x64xf32>
    %22 = tpu.reciprocal %21 {approx = true} : vector<8x64xf32> -> vector<8x64xf32>
    %c0_14 = arith.constant 0 : index
    %c0_15 = arith.constant 0 : index
    %23 = vector.load %arg6[%c0_14, %c0_15] : memref<8x64xf32, #tpu.memory_space<vmem>>, vector<8x64xf32>
    tpu.vector_store %arg6[%c0_14, %c0_15], %22 {strides = array<i32>} : memref<8x64xf32, #tpu.memory_space<vmem>>, vector<8x64xf32>,
    return
  }
  func.func @transform_0(%arg0: i32) -> (i32, i32) {
    %c0_i32 = arith.constant 0 : i32
    %c0_i32_0 = arith.constant 0 : i32
    return %arg0, %c0_i32 : i32, i32
  }
  func.func @transform_1(%arg0: i32) -> (i32, i32) {
    %c0_i32 = arith.constant 0 : i32
    %c0_i32_0 = arith.constant 0 : i32
    %c0_i32_1 = arith.constant 0 : i32
    return %c0_i32, %c0_i32_0 : i32, i32
  }
  func.func @transform_2(%arg0: i32) -> (i32, i32) {
    %c0_i32 = arith.constant 0 : i32
    %c0_i32_0 = arith.constant 0 : i32
    %c0_i32_1 = arith.constant 0 : i32
    return %c0_i32, %c0_i32_0 : i32, i32
  }
  func.func @transform_3(%arg0: i32) -> (i32, i32) {
    %c0_i32 = arith.constant 0 : i32
    %c0_i32_0 = arith.constant 0 : i32
    %c0_i32_1 = arith.constant 0 : i32
    return %c0_i32, %c0_i32_0 : i32, i32
  }
  func.func @transform_4(%arg0: i32) -> (i32, i32) {
    %c0_i32 = arith.constant 0 : i32
    %c0_i32_0 = arith.constant 0 : i32
    %c0_i32_1 = arith.constant 0 : i32
    return %c0_i32, %c0_i32_0 : i32, i32
  }
  func.func @transform_5(%arg0: i32) -> (i32, i32) {
    %c0_i32 = arith.constant 0 : i32
    %c0_i32_0 = arith.constant 0 : i32
    return %arg0, %c0_i32 : i32, i32
  }
}

</mosaic_0001>

<bundles_post_ra>
// kernel: net_forward.1
= control target key start
LH: loop header
LB: loop body
LE: loop exit
PB: predicated region body
PF: predicated region fallthrough
CT: control target
= control target key end

     0   :  { %10 = vsyncpa [#allocation3], 0  ;;  %s1070_s0 = inlined_call_operand.vmem [shape: f32[8,768], index: 0, kind: input, shape index: {}]   ;;  %s1071_s1 = inlined_call_operand.hbm [shape: bf16[768,128], index: 1, kind: input, shape index: {}]   ;;  %s1072_s2 = inlined_call_operand.vmem [shape: f32[1,128], index: 2, kind: input, shape index: {}]   ;;  %s1073_s3 = inlined_call_operand.vmem [shape: bf16[128,64], index: 3, kind: input, shape index: {}]   ;;  %s1074_s4 = inlined_call_operand.vmem [shape: f32[1,64], index: 4, kind: input, shape index: {}]   ;;  %s1075_s5 = inlined_call_operand.hbm [shape: f32[8,64], index: 5, kind: output, shape index: {}]  }
   0x1   :  { %11 = vsyncpa [#allocation4], 0  ;;  %s962_s18 = smov [#allocation2]   ;;  %s914_s22 = scalar_lea.hbm %s1071_s1, 6144 }
   0x2   :  { %s19_s19 = sshll.u32 %s962_s18, 4  ;;  %p915_p0 = scmp.ne.s32.totalorder %s1071_s1, %s914_s22  ;;  %s20_s19 = int_to_ptr.vmem [resolvable:$true] %s19_s19 }
   0x3   :  { %p918_p1 = scmp.lt.u32.totalorder %s914_s22, %s1071_s1 }
   0x5   :  { %p920_p2 = pnand %p918_p1, %p915_p0 }
   0x7   :  { %923 = shalt.err (!%p920_p2)
}
   0x8   :  { %s924_s27 = scalar_lea.vmem %s20_s19, 6144  ;;  %p929_p4 = scmp.lt.s32.totalorder %s20_s19, %s20_s19 }
   0x9   :  { %p925_p3 = scmp.ne.s32.totalorder %s20_s19, %s924_s27  ;;  %p930_p5 = scmp.lt.s32.totalorder %s924_s27, %s924_s27 }
   0xb   :  { %p931_p6 = por %p930_p5, %p929_p4 }
   0xd   :  { %p932_p7 = pnand %p931_p6, %p925_p3 }
   0xf   :  { %935 = shalt.err (!%p932_p7)
}
  0x10   :  { %s963_s28 = smov 64   ;;  %s964_s29 = smov 4  }
  0x11   :  { %25 = dma.hbm_to_vmem [thread:$0]  %s1071_s1, 6144, %s20_s19, [#allocation3], %s963_s28, %s963_s28, %s964_s29  }
  0x12   :  { %958 = dma.done.wait [#allocation3], 6144  }
  0x13   :  { %959 = vsyncadd [#allocation3], 4294961152  ;;  %v854_v0 = vld [vmem:[#allocation2 + $0x40] sm:$0xff]   ;;  %v858_v4 = vld [vmem:[#allocation2 + $0x48] sm:$0xff]   ;;  %v965_v61 = vmov 0.0   ;;  %vm966_vm0 = vmmov 0  }
  0x14   :  { %v855_v1 = vld [vmem:[#allocation2] sm:$0xff]   ;;  %753 = vmatprep.subr.bf16.mxu0 %v854_v0  ;;  %v859_v5 = vld [vmem:[#allocation2 + $0x8] sm:$0xff]   ;;  %v862_v8 = vld [vmem:[#allocation2 + $0x50] sm:$0xff]   ;;  %s967_s9 = smov [#allocation5]   ;;  %vm678_vm1 = vcmask 523264  }
  0x15   :  { %v856_v2 = vld [vmem:[#allocation2 + $0xc0] sm:$0xff]   ;;  %754 = vmatpush3.bf16.msra.mxu0 %v855_v1  ;;  %v860_v6 = vld [vmem:[#allocation2 + $0xc8] sm:$0xff]   ;;  %v863_v9 = vld [vmem:[#allocation2 + $0x10] sm:$0xff]   ;;  %s686_s10 = sshll.u32 %s967_s9, 4  ;;  %s687_s10 = int_to_ptr.vmem [resolvable:$true] %s686_s10 }
  0x16   :  { %v857_v3 = vld [vmem:[#allocation2 + $0x80] sm:$0xff]   ;;  %775 = vmatprep.subr.bf16.mxu1 %v856_v2  ;;  %755 = vmatprep.subr.bf16.mxu0 %v858_v4  ;;  %v861_v7 = vld [vmem:[#allocation2 + $0x88] sm:$0xff]   ;;  %v864_v10 = vld [vmem:[#allocation2 + $0xd0] sm:$0xff]   ;;  %s936_s11 = scalar_lea.vmem %s687_s10, 128  ;;  %p941_p9 = scmp.lt.s32.totalorder %s687_s10, %s687_s10 }
  0x17   :  { %776 = vmatpush3.bf16.msra.mxu1 %v857_v3  ;;  %v865_v11 = vld [vmem:[#allocation2 + $0x90] sm:$0xff]   ;;  %v866_v12 = vld [vmem:[#allocation2 + $0x58] sm:$0xff]   ;;  %v870_v16 = vld [vmem:[#allocation2 + $0x60] sm:$0xff]   ;;  %p937_p8 = scmp.ne.s32.totalorder %s687_s10, %s936_s11  ;;  %p942_p10 = scmp.lt.s32.totalorder %s936_s11, %s936_s11 }
  0x18   :  { %777 = vmatprep.subr.bf16.mxu1 %v860_v6  ;;  %v867_v13 = vld [vmem:[#allocation2 + $0x18] sm:$0xff]   ;;  %v871_v17 = vld [vmem:[#allocation2 + $0x20] sm:$0xff]   ;;  %v874_v20 = vld [vmem:[#allocation2 + $0x68] sm:$0xff]  }
  0x19   :  { %756 = vmatpush3.bf16.msra.mxu0 %v859_v5  ;;  %v868_v14 = vld [vmem:[#allocation2 + $0xd8] sm:$0xff]   ;;  %v872_v18 = vld [vmem:[#allocation2 + $0xe0] sm:$0xff]   ;;  %v875_v21 = vld [vmem:[#allocation2 + $0x28] sm:$0xff]   ;;  %p943_p11 = por %p942_p10, %p941_p9 }
  0x1a   :  { %757 = vmatprep.subr.bf16.mxu0 %v862_v8  ;;  %v869_v15 = vld [vmem:[#allocation2 + $0x98] sm:$0xff]   ;;  %v873_v19 = vld [vmem:[#allocation2 + $0xa0] sm:$0xff]   ;;  %v876_v22 = vld [vmem:[#allocation2 + $0xe8] sm:$0xff]  }
  0x1b   :  { %778 = vmatpush3.bf16.msra.mxu1 %v861_v7  ;;  %v877_v23 = vld [vmem:[#allocation2 + $0xa8] sm:$0xff]   ;;  %v878_v24 = vld [vmem:[#allocation2 + $0x70] sm:$0xff]   ;;  %v882_v28 = vld [vmem:[#allocation2 + $0x78] sm:$0xff]   ;;  %p944_p12 = pnand %p943_p11, %p937_p8 }
  0x1c   :  { %779 = vmatprep.subr.bf16.mxu1 %v864_v10  ;;  %v879_v25 = vld [vmem:[#allocation2 + $0x30] sm:$0xff]   ;;  %v883_v29 = vld [vmem:[#allocation2 + $0x38] sm:$0xff]   ;;  %v37_v31 = vld [vmem:[%s1070_s0 + $0x8] sm:$0xff] }
  0x1d   :  { %758 = vmatpush3.bf16.msra.mxu0 %v863_v9  ;;  %v880_v26 = vld [vmem:[#allocation2 + $0xf0] sm:$0xff]   ;;  %v884_v30 = vld [vmem:[#allocation2 + $0xf8] sm:$0xff]   ;;  %v43_v32 = vpack.c.bf16 %v37_v31, %v37_v31  ;;  %v36_v34 = vld [vmem:[%s1070_s0] sm:$0xff] }
  0x1e   :  { %759 = vmatprep.subr.bf16.mxu0 %v866_v12  ;;  %v881_v27 = vld [vmem:[#allocation2 + $0xb0] sm:$0xff]   ;;  %v885_v33 = vld [vmem:[#allocation2 + $0xb8] sm:$0xff]   ;;  %v42_v35 = vpack.c.bf16 %v36_v34, %v36_v34  ;;  %v886_v36 = vld [vmem:[#allocation2 + $0x140] sm:$0xff]  }
  0x1f   :  { %780 = vmatpush3.bf16.msra.mxu1 %v865_v11  ;;  %v39_v37 = vld [vmem:[%s1070_s0 + $0x18] sm:$0xff]  ;;  %471 = vmatprep.mubr.bf16.mxu0 %v43_v32  ;;  %v887_v39 = vld [vmem:[#allocation2 + $0x100] sm:$0xff]   ;;  %v38_v40 = vld [vmem:[%s1070_s0 + $0x10] sm:$0xff] }
  0x20   :  { %781 = vmatprep.subr.bf16.mxu1 %v868_v14  ;;  %v45_v38 = vpack.c.bf16 %v39_v37, %v39_v37  ;;  %v44_v41 = vpack.c.bf16 %v38_v40, %v38_v40  ;;  %v888_v42 = vld [vmem:[#allocation2 + $0x148] sm:$0xff]   ;;  %v890_v44 = vld [vmem:[#allocation2 + $0x150] sm:$0xff]   ;;  %v892_v46 = vld [vmem:[#allocation2 + $0x158] sm:$0xff]  }
  0x21   :  { %760 = vmatpush3.bf16.msra.mxu0 %v867_v13  ;;  %v889_v43 = vld [vmem:[#allocation2 + $0x108] sm:$0xff]   ;;  %v891_v45 = vld [vmem:[#allocation2 + $0x110] sm:$0xff]   ;;  %v893_v47 = vld [vmem:[#allocation2 + $0x118] sm:$0xff]  }
  0x22   :  { %761 = vmatprep.subr.bf16.mxu0 %v870_v16  ;;  %511 = vmatprep.mubr.bf16.mxu1 %v45_v38  ;;  %v894_v48 = vld [vmem:[#allocation2 + $0x160] sm:$0xff]   ;;  %v896_v50 = vld [vmem:[#allocation2 + $0x168] sm:$0xff]   ;;  %v898_v54 = vld [vmem:[#allocation2 + $0x170] sm:$0xff]  }
  0x23   :  { %782 = vmatpush3.bf16.msra.mxu1 %v869_v15  ;;  %v895_v49 = vld [vmem:[#allocation2 + $0x120] sm:$0xff]   ;;  %v41_v51 = vld [vmem:[%s1070_s0 + $0x28] sm:$0xff]  ;;  %v899_v55 = vld [vmem:[#allocation2 + $0x130] sm:$0xff]  }
  0x24   :  { %783 = vmatprep.subr.bf16.mxu1 %v872_v18  ;;  %v897_v52 = vld [vmem:[#allocation2 + $0x128] sm:$0xff]   ;;  %v47_v53 = vpack.c.bf16 %v41_v51, %v41_v51  ;;  %v900_v56 = vld [vmem:[#allocation2 + $0x178] sm:$0xff]   ;;  %v40_v58 = vld [vmem:[%s1070_s0 + $0x20] sm:$0xff] }
  0x25   :  { %762 = vmatpush3.bf16.msra.mxu0 %v871_v17  ;;  %v901_v57 = vld [vmem:[#allocation2 + $0x138] sm:$0xff]   ;;  %v46_v59 = vpack.c.bf16 %v40_v58, %v40_v58  ;;  %v902_v60 = vld [vmem:[%s1073_s3] sm:$0xff]   ;;  %v903_v62 = vld [vmem:[%s1073_s3 + $0x8] sm:$0xff]  }
  0x26   :  { %763 = vmatprep.subr.bf16.mxu0 %v874_v20  ;;  %v904_v63 = vld [vmem:[%s1073_s3 + $0x10] sm:$0xff]   ;;  %v905_v0 = vld [vmem:[%s1073_s3 + $0x18] sm:$0xff]   ;;  %v906_v1 = vld [vmem:[%s1073_s3 + $0x20] sm:$0xff]  }
  0x27   :  { %784 = vmatpush3.bf16.msra.mxu1 %v873_v19  ;;  %v907_v2 = vld [vmem:[%s1073_s3 + $0x28] sm:$0xff]   ;;  %v908_v3 = vld [vmem:[%s1073_s3 + $0x30] sm:$0xff]   ;;  %v909_v4 = vld [vmem:[%s1073_s3 + $0x38] sm:$0xff]  }
  0x28   :  { %785 = vmatprep.subr.bf16.mxu1 %v876_v22  ;;  %v695_v6 = vld [vmem:[%s1072_s2] ss:$0 sm:$0xff] }
  0x29   :  { %764 = vmatpush3.bf16.msra.mxu0 %v875_v21 }
  0x2a   :  { %765 = vmatprep.subr.bf16.mxu0 %v878_v24 }
  0x2b   :  { %786 = vmatpush3.bf16.msra.mxu1 %v877_v23 }
  0x2c   :  { %787 = vmatprep.subr.bf16.mxu1 %v880_v26  ;;  %v744_v26 = vld [vmem:[%s1074_s4] ss:$0 sm:$0xff] }
  0x2d   :  { %766 = vmatpush3.bf16.msra.mxu0 %v879_v25 }
  0x2e   :  { %767 = vmatprep.subr.bf16.mxu0 %v882_v28 }
  0x2f   :  { %788 = vmatpush3.bf16.msra.mxu1 %v881_v27 }
  0x30   :  { %789 = vmatprep.subr.bf16.mxu1 %v884_v30 }
  0x31   :  { %768 = vmatpush3.bf16.msra.mxu0 %v883_v29 }
  0x32   :  { %797 = vmatprep.subr.bf16.mxu0 %v886_v36 }
  0x33   :  { %790 = vmatpush3.bf16.msra.mxu1 %v885_v33 }
  0x34   :  { %472 = vmatmul.mubr.bf16.vlgmr.msra.gmra.mrb[0].mxu0 %v42_v35  ;;  %828 = vmatprep.subr.bf16.mxu1 %v965_v61 }
  0x35   :  { %798 = vmatpush3.bf16.msra.mxu0 %v887_v39  ;;  %551 = vmatprep.mubr.bf16.mxu0 %v47_v53 }
  0x36   :  { %512 = vmatmul.mubr.bf16.vlgmr.msra.gmra.mrb[0].mxu1 %v44_v41  ;;  %799 = vmatprep.subr.bf16.mxu0 %v888_v42 }
  0x37   :  { %829 = vmatpush3.bf16.msra.mxu1 %v902_v60  ;;  %844 = vmatprep.mubr.msk.bf16.mxu1 %vm966_vm0, %v965_v61 }
  0x38   :  { %830 = vmatprep.subr.bf16.mxu1 %v965_v61 }
  0x39   :  { %800 = vmatpush3.bf16.msra.mxu0 %v889_v43 }
  0x3a   :  { %801 = vmatprep.subr.bf16.mxu0 %v890_v44 }
  0x3b   :  { %831 = vmatpush3.bf16.msra.mxu1 %v903_v62 }
  0x3c   :  { %832 = vmatprep.subr.bf16.mxu1 %v965_v61 }
  0x3d   :  { %802 = vmatpush3.bf16.msra.mxu0 %v891_v45 }
  0x3e   :  { %803 = vmatprep.subr.bf16.mxu0 %v892_v46 }
  0x3f   :  { %833 = vmatpush3.bf16.msra.mxu1 %v904_v63 }
  0x40   :  { %834 = vmatprep.subr.bf16.mxu1 %v965_v61 }
  0x41   :  { %804 = vmatpush3.bf16.msra.mxu0 %v893_v47 }
  0x42   :  { %805 = vmatprep.subr.bf16.mxu0 %v894_v48 }
  0x43   :  { %835 = vmatpush3.bf16.msra.mxu1 %v905_v0 }
  0x44   :  { %836 = vmatprep.subr.bf16.mxu1 %v965_v61 }
  0x45   :  { %806 = vmatpush3.bf16.msra.mxu0 %v895_v49 }
  0x46   :  { %807 = vmatprep.subr.bf16.mxu0 %v896_v50 }
  0x47   :  { %837 = vmatpush3.bf16.msra.mxu1 %v906_v1 }
  0x48   :  { %838 = vmatprep.subr.bf16.mxu1 %v965_v61 }
  0x49   :  { %808 = vmatpush3.bf16.msra.mxu0 %v897_v52 }
  0x4a   :  { %809 = vmatprep.subr.bf16.mxu0 %v898_v54 }
  0x4b   :  { %839 = vmatpush3.bf16.msra.mxu1 %v907_v2 }
  0x4c   :  { %840 = vmatprep.subr.bf16.mxu1 %v965_v61 }
  0x4d   :  { %810 = vmatpush3.bf16.msra.mxu0 %v899_v55 }
  0x4e   :  { %811 = vmatprep.subr.bf16.mxu0 %v900_v56 }
  0x4f   :  { %841 = vmatpush3.bf16.msra.mxu1 %v908_v3 }
  0x50   :  { %842 = vmatprep.subr.bf16.mxu1 %v965_v61 }
  0x51   :  { %812 = vmatpush3.bf16.msra.mxu0 %v901_v57 }
  0x53   :  { %843 = vmatpush3.bf16.msra.mxu1 %v909_v4 }
  0x54   :  { %552 = vmatmul.mubr.bf16.vlgmr.msra.gmra.mrb[4].mxu0 %v46_v59 }
 0x107   :  { %v769_v5 = vpop.f32.mrb[0].mxu0 }
 0x108   :  { %v770_v7 = vpop.f32.mrb[1].mxu0 }
 0x109   :  { %v771_v8 = vadd.f32 %v770_v7, %v769_v5  ;;  %v772_v9 = vpop.f32.mrb[2].mxu0  ;;  %v791_v10 = vpop.f32.mrb[0].mxu1 }
 0x10a   :  { %v773_v11 = vpop.f32.mrb[3].mxu0  ;;  %v792_v13 = vpop.f32.mrb[1].mxu1 }
 0x10b   :  { %v474_v12 = vadd.f32 %v771_v8, %v695_v6  ;;  %v793_v14 = vadd.f32 %v792_v13, %v791_v10  ;;  %v794_v15 = vpop.f32.mrb[2].mxu1 }
 0x10c   :  { %v795_v16 = vpop.f32.mrb[3].mxu1 }
 0x10d   :  { %v514_v17 = vadd.f32 %v793_v14, %v474_v12 }
 0x127   :  { %v813_v18 = vpop.f32.mrb[4].mxu0 }
 0x128   :  { %v814_v19 = vpop.f32.mrb[5].mxu0 }
 0x129   :  { %v815_v20 = vadd.f32 %v814_v19, %v813_v18  ;;  %v816_v21 = vpop.f32.mrb[6].mxu0 }
 0x12a   :  { %v817_v22 = vpop.f32.mrb[7].mxu0 }
 0x12b   :  { %v554_v23 = vadd.f32 %v815_v20, %v514_v17 }
 0x12d   :  { %v559_v24 = vmax.f32 %v554_v23, 0.0 }
 0x12f   :  { %v560_v25 = vpack.c.bf16 %v559_v24, %v559_v24 }
 0x131   :  { %845 = vmatmul.mubr.bf16.vlgmr.msra.gmra.mrb[4].mxu1 %v560_v25 }
 0x204   :  { %v666_v27 = vpop.f32.mrb[4].mxu1 }
 0x205   :  { %v667_v28 = vadd.f32 %v744_v26, %v666_v27  ;;  %v846_v29 = vpop.f32.mrb[5].mxu1 }
 0x206   :  { %v669_v30 = vpop.f32.mrb[6].mxu1 }
 0x207   :  { %v672_v31 = vmax.f32 %v667_v28, 0.0  ;;  %v847_v32 = vpop.f32.mrb[7].mxu1 }
 0x209   :  { %v673_v33 = vsub.f32 0.0, %v672_v31 }
 0x20b   :  { %v674_v34 = vmul.f32 1.442695, %v673_v33 }
 0x20d   :  { %910 = vpow2.f32 %v674_v34 }
 0x217   :  { %v911_v35 = vpop.eup %910 }
 0x218   :  { %v676_v36 = vadd.f32 1.0, %v911_v35 }
 0x21a   :  { %912 = vrcp.f32 %v676_v36 }
 0x224   :  { %v913_v37 = vpop.eup %912 }
 0x225   :  { %679 = vst.msk [vmem:[#allocation5] sm:$0xff] %vm678_vm1, %v913_v37 }
 0x226   :  { %947 = shalt.err (!%p944_p12)
}
 0x227   :  { %s948_s13 = scalar_lea.hbm %s1075_s5, 128 }
 0x228   :  { %p949_p13 = scmp.ne.s32.totalorder %s1075_s5, %s948_s13  ;;  %p952_p0 = scmp.lt.u32.totalorder %s948_s13, %s1075_s5 }
 0x22a   :  { %p954_p1 = pnand %p952_p0, %p949_p13 }
 0x22c   :  { %957 = shalt.err (!%p954_p1)
}
 0x22d   :  { %689 = dma.vmem_to_hbm [thread:$0]  %s687_s10, 128, %s1075_s5, [#allocation4]  }
 0x22e   :  { %960 = dma.done.wait [#allocation4], 128  }
 0x22f   :  { %961 = vsyncadd [#allocation4], 4294967168 }
 0x230   :  { %693 = vsyncpa [#allocation3], 1 }
 0x231   :  { %694 = vsyncpa [#allocation4], 1 }

</bundles_post_ra>
